<compile_context>
chip_gen: v6e
topology: v6e:2x2x1
jax: 0.10.0
libtpu: 0.0.40
codegen_flags: <defaults>
</compile_context>

<pallas_src>
import functools

import jax
import jax.numpy as jnp
from jax.experimental import pallas as pl
from jax.experimental.pallas import tpu as pltpu

L, LP, D, K, F_IN = 250, 256, 64, 1, 512    # LP = hidden width padded to 256 lanes
NEG_BIG = -1e30


def _attention_mil_kernel(x_ref, w1_ref, b1_ref, wa1_ref, ba1_ref,
                          wa2_ref, ba2_ref,
                          logits_ref, acc_part_ref, m_part_ref, l_part_ref,
                          m_s, l_s, acc_s,
                          *, n, num_tiles, tiles_per_core, grid_tiles, tn):
    i = pl.program_id(0)                    # core-split index ("parallel")
    j = pl.program_id(1)                    # tile owned by this core ("arbitrary")
    tile_idx = i * tiles_per_core + j

    @pl.when(j == 0)
    def _init():
        m_s[...] = jnp.full_like(m_s, -jnp.inf)
        l_s[...] = jnp.zeros_like(l_s)
        acc_s[...] = jnp.zeros_like(acc_s)

    def _compute_tile():
        # rows of this tile inside the true bag (x is not padded in HBM, so the
        # ragged last tile contains garbage rows that must be masked here).
        row = tile_idx * tn + jax.lax.broadcasted_iota(jnp.int32, (tn, 1), 0)
        valid = row < n

        # feature_extractor_part2: ReLU(x @ W1 + b1) — bf16 operands, f32 accum.
        xb = x_ref[...].astype(jnp.bfloat16)
        h = jnp.dot(xb, w1_ref[...], preferred_element_type=jnp.float32)
        h = jnp.maximum(h + b1_ref[...], 0.0)
        h = jnp.where(valid, h, 0.0)                                # (tn, 256) f32

        # attention logit as a (tn, 1) column: tanh(H @ Wa1 + ba1) . wa2 + ba2
        a_hid = jnp.tanh(
            jnp.dot(h.astype(jnp.bfloat16), wa1_ref[...],
                    preferred_element_type=jnp.float32) + ba1_ref[...])   # (tn, 64)
        logit = (jnp.sum(a_hid * wa2_ref[...], axis=-1, keepdims=True)
                 + ba2_ref[...])                                    # (tn, 1)
        logit = jnp.where(valid, logit, NEG_BIG)

        # lane-dense raw logits out; the wrapper does the final softmax over N.
        logits_ref[...] = jnp.transpose(logit)                      # (1, tn)

        # online softmax over the bag dimension (running max / sum / weighted H);
        # the A@H contraction is a VPU broadcast-mul + sublane reduce.
        m_prev = m_s[...]
        m_new = jnp.maximum(m_prev, jnp.max(logit, axis=0, keepdims=True))
        corr = jnp.exp(m_prev - m_new)                              # (1, 1)
        p = jnp.exp(logit - m_new)                                  # (tn, 1)
        l_s[...] = corr * l_s[...] + jnp.sum(p, axis=0, keepdims=True)
        acc_s[...] = corr * acc_s[...] + jnp.sum(p * h, axis=0, keepdims=True)
        m_s[...] = m_new

    if grid_tiles > num_tiles:
        # skip compute entirely on duplicated padding tiles (last core only).
        pl.when(tile_idx < num_tiles)(_compute_tile)
    else:
        _compute_tile()

    # emit this core's online-softmax partial state; combined in the wrapper.
    @pl.when(j == tiles_per_core - 1)
    def _finalize():
        acc_part_ref[...] = acc_s[...][None]                            # (1,1,LP)
        m_part_ref[...] = jnp.broadcast_to(m_s[...], (1, LP))[None]
        l_part_ref[...] = jnp.broadcast_to(l_s[...], (1, LP))[None]


def attention_forward(x, params, *, tn=1024, num_core_splits=2):
    """x: (1, N, 512) float32 bag. Returns (Y_prob (1,1), Y_hat (1,1), A (1,N)).

    tn: bag-dim tile (multiple of 128). 1024 fits every generation's default
    scoped VMEM with f32 x double-buffered; 2048 is fine on v6e/v7x.
    num_core_splits: leading "parallel" grid axis width (2 uses both v7x
    TensorCores; harmless serial outer loop on 1-TC v5e/v6e)."""
    x2 = x.reshape(-1, F_IN)                     # squeeze(0) + view(-1, 512)
    n = x2.shape[0]
    assert n >= 1, "empty bag not supported"

    tn = max(128, (tn // 128) * 128)
    tn_eff = min(tn, ((n + 7) // 8) * 8)         # shrink the tile for tiny bags
    num_tiles = -(-n // tn_eff)

    C = num_core_splits if num_tiles >= num_core_splits else 1
    T = -(-num_tiles // C)
    grid_tiles = C * T
    last_blk = num_tiles - 1

    # weights: hidden width 250 -> 256 zero-pad; MXU operands in bf16 (one-time).
    w1 = jnp.pad(params["w1"], ((0, 0), (0, LP - L))).astype(jnp.bfloat16)    # (512,256)
    b1 = jnp.pad(params["b1"], ((0, 0), (0, LP - L)))                         # (1,256)
    wa1 = jnp.pad(params["wa1"], ((0, LP - L), (0, 0))).astype(jnp.bfloat16)  # (256,64)
    ba1 = params["ba1"]                                                       # (1,64)
    wa2_row = params["wa2"].T                                                 # (1,64)
    ba2 = params["ba2"]                                                       # (1,1)

    kernel = functools.partial(_attention_mil_kernel, n=n, num_tiles=num_tiles,
                               tiles_per_core=T, grid_tiles=grid_tiles, tn=tn_eff)

    logits, acc_p, m_p, l_p = pl.pallas_call(
        kernel,
        grid=(C, T),
        in_specs=[
            # x: f32, unpadded; duplicated tiles are clamped to the last real
            # block (their compute is skipped / masked in-kernel).
            pl.BlockSpec((tn_eff, F_IN),
                         lambda i, j: (jnp.minimum(i * T + j, last_blk), 0)),
            pl.BlockSpec((F_IN, LP), lambda i, j: (0, 0)),   # W1  (resident, bf16)
            pl.BlockSpec((1, LP),    lambda i, j: (0, 0)),   # b1
            pl.BlockSpec((LP, D),    lambda i, j: (0, 0)),   # Wa1 (resident, bf16)
            pl.BlockSpec((1, D),     lambda i, j: (0, 0)),   # ba1
            pl.BlockSpec((1, D),     lambda i, j: (0, 0)),   # wa2 row
            pl.BlockSpec((1, 1),     lambda i, j: (0, 0)),   # ba2
        ],
        out_specs=[
            pl.BlockSpec((1, tn_eff), lambda i, j: (0, i * T + j)),  # raw logits
            pl.BlockSpec((1, 1, LP),  lambda i, j: (i, 0, 0)),       # acc partial
            pl.BlockSpec((1, 1, LP),  lambda i, j: (i, 0, 0)),       # m partial
            pl.BlockSpec((1, 1, LP),  lambda i, j: (i, 0, 0)),       # l partial
        ],
        out_shape=(
            jax.ShapeDtypeStruct((1, grid_tiles * tn_eff), jnp.float32),
            jax.ShapeDtypeStruct((C, 1, LP), jnp.float32),
            jax.ShapeDtypeStruct((C, 1, LP), jnp.float32),
            jax.ShapeDtypeStruct((C, 1, LP), jnp.float32),
        ),
        scratch_shapes=[
            pltpu.VMEM((1, 1), jnp.float32),    # running max
            pltpu.VMEM((1, 1), jnp.float32),    # running sum of exp
            pltpu.VMEM((1, LP), jnp.float32),   # running sum of exp * H
        ],
        compiler_params=pltpu.CompilerParams(
            dimension_semantics=("parallel", "arbitrary"),
            vmem_limit_bytes=32 * 1024 * 1024),
    )(x2, w1, b1, wa1, ba1, wa2_row, ba2)

    # combine the per-core online-softmax partials (tiny) + classifier head.
    m_c = m_p[:, 0, 0]                                   # (C,)
    l_c = l_p[:, 0, 0]                                   # (C,)
    acc_c = acc_p[:, 0, :]                               # (C, LP)
    scale = jnp.exp(m_c - jnp.max(m_c))                  # (C,)
    l_tot = jnp.sum(l_c * scale)
    m_vec = jnp.sum(acc_c * scale[:, None], axis=0, keepdims=True) / l_tot   # (1, LP)

    wc = jnp.pad(params["wc"], ((0, LP - L), (0, 0)))    # (256, 1)
    y_prob = jax.nn.sigmoid(m_vec @ wc + params["bc"])   # (1, 1)
    y_hat = (y_prob >= 0.5).astype(jnp.float32)

    A = jax.nn.softmax(logits[:, :n], axis=1)            # (1, N)
    return y_prob, y_hat, A


def init_params(key):
    """PyTorch-style uniform(-1/sqrt(fan_in), 1/sqrt(fan_in)) init.
    Weights stored pre-transposed as (in, out); biases as (1, out)."""
    def linear(k, fan_in, fan_out):
        kw, kb = jax.random.split(k)
        bound = 1.0 / jnp.sqrt(jnp.float32(fan_in))
        w = jax.random.uniform(kw, (fan_in, fan_out), jnp.float32, -bound, bound)
        b = jax.random.uniform(kb, (1, fan_out), jnp.float32, -bound, bound)
        return w, b

    k1, k2, k3, k4 = jax.random.split(key, 4)
    w1, b1 = linear(k1, F_IN, L)      # feature_extractor_part2.Linear(512, 250)
    wa1, ba1 = linear(k2, L, D)       # attention.Linear(250, 64)
    wa2, ba2 = linear(k3, D, K)       # attention.Linear(64, 1)
    wc, bc = linear(k4, L * K, 1)     # classifier.Linear(250, 1)
    return dict(w1=w1, b1=b1, wa1=wa1, ba1=ba1, wa2=wa2, ba2=ba2, wc=wc, bc=bc)


def reference_forward(x, params):
    """Pure-JAX f32 reference mirroring the PyTorch module."""
    x2 = x.reshape(-1, F_IN)
    h = jnp.maximum(x2 @ params["w1"] + params["b1"], 0.0)
    logits = jnp.tanh(h @ params["wa1"] + params["ba1"]) @ params["wa2"] + params["ba2"]
    A = jax.nn.softmax(logits.T, axis=1)
    m = A @ h
    y_prob = jax.nn.sigmoid(m @ params["wc"] + params["bc"])
    return y_prob, (y_prob >= 0.5).astype(jnp.float32), A


if __name__ == "__main__":
    key = jax.random.PRNGKey(0)
    k_param, k_x1, k_x2 = jax.random.split(key, 3)
    params = init_params(k_param)

    # small bag: single tile (tn shrinks to the bag size), 1-way core split
    N1 = 8
    x1 = jax.random.normal(k_x1, (1, N1, F_IN), dtype=jnp.float32)
    y_prob, y_hat, A = attention_forward(x1, params)
    jax.block_until_ready((y_prob, y_hat, A))

    yp_ref, _, a_ref = reference_forward(x1, params)
    assert y_prob.shape == (1, 1) and y_hat.shape == (1, 1) and A.shape == (1, N1)
    # tolerance loosened vs f32 reference because the matmuls run in bf16 (f32 accum)
    assert jnp.allclose(y_prob, yp_ref, atol=2e-2), (y_prob, yp_ref)
    assert jnp.allclose(A, a_ref, atol=2e-2)
    assert jnp.array_equal(y_hat, (y_prob >= 0.5).astype(jnp.float32))
    assert bool(jnp.all(jnp.isfinite(A)))

    # larger bag with a small tile: multiple tiles, ragged last tile, 2-way core
    # split with one duplicated (skipped) tile -> exercises the in-kernel row
    # masking, the online-softmax carry and the cross-core partial combine.
    N2 = 600
    x2 = jax.random.normal(k_x2, (1, N2, F_IN), dtype=jnp.float32)
    y_prob2, y_hat2, A2 = attention_forward(x2, params, tn=256)
    jax.block_until_ready((y_prob2, y_hat2, A2))

    yp_ref2, _, a_ref2 = reference_forward(x2, params)
    assert A2.shape == (1, N2)
    assert jnp.allclose(y_prob2, yp_ref2, atol=2e-2), (y_prob2, yp_ref2)
    assert jnp.allclose(A2, a_ref2, atol=2e-2)
    assert abs(float(jnp.sum(A2)) - 1.0) < 1e-3
    assert jnp.array_equal(y_hat2, (y_prob2 >= 0.5).astype(jnp.float32))

    print("KERNEL_OK")
</pallas_src>

<mosaic_0001>
module attributes {stable_mosaic.version = 11 : i64} {
  func.func @_attention_mil_kernel(%arg0: i32, %arg1: i32, %arg2: memref<8x512xf32, #tpu.memory_space<vmem>>, %arg3: memref<512x256xbf16, #tpu.memory_space<vmem>>, %arg4: memref<1x256xf32, #tpu.memory_space<vmem>>, %arg5: memref<256x64xbf16, #tpu.memory_space<vmem>>, %arg6: memref<1x64xf32, #tpu.memory_space<vmem>>, %arg7: memref<1x64xf32, #tpu.memory_space<vmem>>, %arg8: memref<1x1xf32, #tpu.memory_space<vmem>>, %arg9: memref<1x8xf32, #tpu.memory_space<vmem>>, %arg10: memref<1x1x256xf32, #tpu.memory_space<vmem>>, %arg11: memref<1x1x256xf32, #tpu.memory_space<vmem>>, %arg12: memref<1x1x256xf32, #tpu.memory_space<vmem>>, %arg13: memref<1x1xf32, #tpu.memory_space<vmem>>, %arg14: memref<1x1xf32, #tpu.memory_space<vmem>>, %arg15: memref<1x256xf32, #tpu.memory_space<vmem>>) attributes {dimension_semantics = [#tpu.dimension_semantics<parallel>, #tpu.dimension_semantics<arbitrary>], iteration_bounds = array<i64: 1, 1>, scalar_prefetch = 0 : i64, scratch_operands = 3 : i64, tpu.core_type = #tpu.core_type<tc>, window_params = [{transform_indices = @transform_0, window_bounds = array<i64: 8, 512>}, {pipeline_mode = #tpu.pipeline_mode<synchronous>, transform_indices = @transform_1, window_bounds = array<i64: 512, 256>}, {pipeline_mode = #tpu.pipeline_mode<synchronous>, transform_indices = @transform_2, window_bounds = array<i64: 1, 256>}, {pipeline_mode = #tpu.pipeline_mode<synchronous>, transform_indices = @transform_3, window_bounds = array<i64: 256, 64>}, {pipeline_mode = #tpu.pipeline_mode<synchronous>, transform_indices = @transform_4, window_bounds = array<i64: 1, 64>}, {pipeline_mode = #tpu.pipeline_mode<synchronous>, transform_indices = @transform_5, window_bounds = array<i64: 1, 64>}, {pipeline_mode = #tpu.pipeline_mode<synchronous>, transform_indices = @transform_6, window_bounds = array<i64: 1, 1>}, {transform_indices = @transform_7, window_bounds = array<i64: 1, 8>}, {transform_indices = @transform_8, window_bounds = array<i64: 1, 1, 256>}, {transform_indices = @transform_9, window_bounds = array<i64: 1, 1, 256>}, {transform_indices = @transform_10, window_bounds = array<i64: 1, 1, 256>}]} {
    %c1_i32 = arith.constant 1 : i32
    %0 = arith.muli %arg0, %c1_i32 : i32
    %1 = arith.addi %0, %arg1 : i32
    %c0_i32 = arith.constant 0 : i32
    %2 = arith.cmpi eq, %arg1, %c0_i32 : i32
    %3 = arith.extui %2 : i1 to i32
    %c0_i32_0 = arith.constant 0 : i32
    %4 = arith.cmpi ne, %3, %c0_i32_0 : i32
    scf.if %4 {
      %cst_39 = arith.constant 0xFF800000 : f32
      %71 = vector.broadcast %cst_39 : f32 to vector<1x1xf32>
      %c0_40 = arith.constant 0 : index
      %c0_41 = arith.constant 0 : index
      %72 = vector.load %arg13[%c0_40, %c0_41] : memref<1x1xf32, #tpu.memory_space<vmem>>, vector<1x1xf32>
      tpu.vector_store %arg13[%c0_40, %c0_41], %71 {strides = array<i32>} : memref<1x1xf32, #tpu.memory_space<vmem>>, vector<1x1xf32>,
      %cst_42 = arith.constant 0.000000e+00 : f32
      %73 = vector.broadcast %cst_42 : f32 to vector<1x1xf32>
      %c0_43 = arith.constant 0 : index
      %c0_44 = arith.constant 0 : index
      %74 = vector.load %arg14[%c0_43, %c0_44] : memref<1x1xf32, #tpu.memory_space<vmem>>, vector<1x1xf32>
      tpu.vector_store %arg14[%c0_43, %c0_44], %73 {strides = array<i32>} : memref<1x1xf32, #tpu.memory_space<vmem>>, vector<1x1xf32>,
      %cst_45 = arith.constant 0.000000e+00 : f32
      %75 = vector.broadcast %cst_45 : f32 to vector<1x256xf32>
      %c0_46 = arith.constant 0 : index
      %c0_47 = arith.constant 0 : index
      %76 = vector.load %arg15[%c0_46, %c0_47] : memref<1x256xf32, #tpu.memory_space<vmem>>, vector<1x256xf32>
      tpu.vector_store %arg15[%c0_46, %c0_47], %75 {strides = array<i32>} : memref<1x256xf32, #tpu.memory_space<vmem>>, vector<1x256xf32>,
    } else {
    }
    %c8_i32 = arith.constant 8 : i32
    %5 = arith.muli %1, %c8_i32 : i32
    %6 = tpu.iota {dimensions = array<i32: 0>} : vector<8x1xi32>
    %7 = vector.broadcast %5 : i32 to vector<8x1xi32>
    %8 = arith.addi %7, %6 : vector<8x1xi32>
    %c8_i32_1 = arith.constant 8 : i32
    %9 = vector.broadcast %c8_i32_1 : i32 to vector<8x1xi32>
    %10 = arith.cmpi slt, %8, %9 : vector<8x1xi32>
    %c0 = arith.constant 0 : index
    %c0_2 = arith.constant 0 : index
    %11 = vector.load %arg2[%c0, %c0_2] : memref<8x512xf32, #tpu.memory_space<vmem>>, vector<8x512xf32>
    %12 = arith.truncf %11 : vector<8x512xf32> to vector<8x512xbf16>
    %c0_3 = arith.constant 0 : index
    %c0_4 = arith.constant 0 : index
    %13 = vector.load %arg3[%c0_3, %c0_4] : memref<512x256xbf16, #tpu.memory_space<vmem>>, vector<512x256xbf16>
    %cst = arith.constant dense<0.000000e+00> : vector<8x256xf32>
    %14 = tpu.matmul %12, %13, %cst {dimension_numbers = #tpu.dot_dimension_numbers<[1], [0], [0], [1], [0, 0, 1, 1], [], []>} : vector<8x512xbf16>, vector<512x256xbf16>, vector<8x256xf32> -> vector<8x256xf32>
    %c0_5 = arith.constant 0 : index
    %c0_6 = arith.constant 0 : index
    %15 = vector.load %arg4[%c0_5, %c0_6] : memref<1x256xf32, #tpu.memory_space<vmem>>, vector<1x256xf32>
    %16 = vector.broadcast %15 : vector<1x256xf32> to vector<8x256xf32>
    %17 = arith.addf %14, %16 : vector<8x256xf32>
    %cst_7 = arith.constant 0.000000e+00 : f32
    %18 = vector.broadcast %cst_7 : f32 to vector<8x256xf32>
    %19 = arith.maximumf %17, %18 : vector<8x256xf32>
    %cst_8 = arith.constant 0.000000e+00 : f32
    %20 = vector.shape_cast %10 : vector<8x1xi1> to vector<8x1xi1>
    %21 = vector.broadcast %20 : vector<8x1xi1> to vector<8x256xi1>
    %22 = vector.broadcast %cst_8 : f32 to vector<8x256xf32>
    %23 = arith.select %21, %19, %22 : vector<8x256xi1>, vector<8x256xf32>
    %24 = arith.truncf %23 : vector<8x256xf32> to vector<8x256xbf16>
    %c0_9 = arith.constant 0 : index
    %c0_10 = arith.constant 0 : index
    %25 = vector.load %arg5[%c0_9, %c0_10] : memref<256x64xbf16, #tpu.memory_space<vmem>>, vector<256x64xbf16>
    %cst_11 = arith.constant dense<0.000000e+00> : vector<8x64xf32>
    %26 = tpu.matmul %24, %25, %cst_11 {dimension_numbers = #tpu.dot_dimension_numbers<[1], [0], [0], [1], [0, 0, 1, 1], [], []>} : vector<8x256xbf16>, vector<256x64xbf16>, vector<8x64xf32> -> vector<8x64xf32>
    %c0_12 = arith.constant 0 : index
    %c0_13 = arith.constant 0 : index
    %27 = vector.load %arg6[%c0_12, %c0_13] : memref<1x64xf32, #tpu.memory_space<vmem>>, vector<1x64xf32>
    %28 = vector.broadcast %27 : vector<1x64xf32> to vector<8x64xf32>
    %29 = arith.addf %26, %28 : vector<8x64xf32>
    %30 = math.tanh %29 : vector<8x64xf32>
    %c0_14 = arith.constant 0 : index
    %c0_15 = arith.constant 0 : index
    %31 = vector.load %arg7[%c0_14, %c0_15] : memref<1x64xf32, #tpu.memory_space<vmem>>, vector<1x64xf32>
    %32 = vector.broadcast %31 : vector<1x64xf32> to vector<8x64xf32>
    %33 = arith.mulf %30, %32 : vector<8x64xf32>
    %cst_16 = arith.constant dense<0.000000e+00> : vector<8xf32>
    %34 = vector.multi_reduction <add>, %33, %cst_16 [1] : vector<8x64xf32> to vector<8xf32>
    %35 = vector.shape_cast %34 : vector<8xf32> to vector<8x1xf32>
    %c0_17 = arith.constant 0 : index
    %c0_18 = arith.constant 0 : index
    %36 = vector.load %arg8[%c0_17, %c0_18] : memref<1x1xf32, #tpu.memory_space<vmem>>, vector<1x1xf32>
    %37 = vector.broadcast %36 : vector<1x1xf32> to vector<8x1xf32>
    %38 = arith.addf %35, %37 : vector<8x1xf32>
    %cst_19 = arith.constant -1.000000e+30 : f32
    %39 = vector.broadcast %cst_19 : f32 to vector<8x1xf32>
    %40 = arith.select %10, %38, %39 : vector<8x1xi1>, vector<8x1xf32>
    %41 = tpu.transpose %40, [1, 0] : vector<8x1xf32> -> vector<1x8xf32>
    %c0_20 = arith.constant 0 : index
    %c0_21 = arith.constant 0 : index
    %42 = vector.load %arg9[%c0_20, %c0_21] : memref<1x8xf32, #tpu.memory_space<vmem>>, vector<1x8xf32>
    tpu.vector_store %arg9[%c0_20, %c0_21], %41 {strides = array<i32>} : memref<1x8xf32, #tpu.memory_space<vmem>>, vector<1x8xf32>,
    %c0_22 = arith.constant 0 : index
    %c0_23 = arith.constant 0 : index
    %43 = vector.load %arg13[%c0_22, %c0_23] : memref<1x1xf32, #tpu.memory_space<vmem>>, vector<1x1xf32>
    %cst_24 = arith.constant dense<0xFF800000> : vector<1xf32>
    %44 = vector.multi_reduction <maximumf>, %40, %cst_24 [0] : vector<8x1xf32> to vector<1xf32>
    %45 = vector.shape_cast %44 : vector<1xf32> to vector<1x1xf32>
    %46 = arith.maximumf %43, %45 : vector<1x1xf32>
    %47 = arith.subf %43, %46 : vector<1x1xf32>
    %48 = math.exp %47 : vector<1x1xf32>
    %49 = vector.broadcast %46 : vector<1x1xf32> to vector<8x1xf32>
    %50 = arith.subf %40, %49 : vector<8x1xf32>
    %51 = math.exp %50 : vector<8x1xf32>
    %c0_25 = arith.constant 0 : index
    %c0_26 = arith.constant 0 : index
    %52 = vector.load %arg14[%c0_25, %c0_26] : memref<1x1xf32, #tpu.memory_space<vmem>>, vector<1x1xf32>
    %53 = arith.mulf %48, %52 : vector<1x1xf32>
    %cst_27 = arith.constant dense<0.000000e+00> : vector<1xf32>
    %54 = vector.multi_reduction <add>, %51, %cst_27 [0] : vector<8x1xf32> to vector<1xf32>
    %55 = vector.shape_cast %54 : vector<1xf32> to vector<1x1xf32>
    %56 = arith.addf %53, %55 : vector<1x1xf32>
    %c0_28 = arith.constant 0 : index
    %c0_29 = arith.constant 0 : index
    %57 = vector.load %arg14[%c0_28, %c0_29] : memref<1x1xf32, #tpu.memory_space<vmem>>, vector<1x1xf32>
    tpu.vector_store %arg14[%c0_28, %c0_29], %56 {strides = array<i32>} : memref<1x1xf32, #tpu.memory_space<vmem>>, vector<1x1xf32>,
    %c0_30 = arith.constant 0 : index
    %c0_31 = arith.constant 0 : index
    %58 = vector.load %arg15[%c0_30, %c0_31] : memref<1x256xf32, #tpu.memory_space<vmem>>, vector<1x256xf32>
    %59 = vector.broadcast %48 : vector<1x1xf32> to vector<1x256xf32>
    %60 = arith.mulf %59, %58 : vector<1x256xf32>
    %61 = vector.broadcast %51 : vector<8x1xf32> to vector<8x256xf32>
    %62 = arith.mulf %61, %23 : vector<8x256xf32>
    %cst_32 = arith.constant dense<0.000000e+00> : vector<256xf32>
    %63 = vector.multi_reduction <add>, %62, %cst_32 [0] : vector<8x256xf32> to vector<256xf32>
    %64 = vector.shape_cast %63 : vector<256xf32> to vector<1x256xf32>
    %65 = arith.addf %60, %64 : vector<1x256xf32>
    %c0_33 = arith.constant 0 : index
    %c0_34 = arith.constant 0 : index
    %66 = vector.load %arg15[%c0_33, %c0_34] : memref<1x256xf32, #tpu.memory_space<vmem>>, vector<1x256xf32>
    tpu.vector_store %arg15[%c0_33, %c0_34], %65 {strides = array<i32>} : memref<1x256xf32, #tpu.memory_space<vmem>>, vector<1x256xf32>,
    %c0_35 = arith.constant 0 : index
    %c0_36 = arith.constant 0 : index
    %67 = vector.load %arg13[%c0_35, %c0_36] : memref<1x1xf32, #tpu.memory_space<vmem>>, vector<1x1xf32>
    tpu.vector_store %arg13[%c0_35, %c0_36], %46 {strides = array<i32>} : memref<1x1xf32, #tpu.memory_space<vmem>>, vector<1x1xf32>,
    %c0_i32_37 = arith.constant 0 : i32
    %68 = arith.cmpi eq, %arg1, %c0_i32_37 : i32
    %69 = arith.extui %68 : i1 to i32
    %c0_i32_38 = arith.constant 0 : i32
    %70 = arith.cmpi ne, %69, %c0_i32_38 : i32
    scf.if %70 {
      %c0_39 = arith.constant 0 : index
      %c0_40 = arith.constant 0 : index
      %71 = vector.load %arg15[%c0_39, %c0_40] : memref<1x256xf32, #tpu.memory_space<vmem>>, vector<1x256xf32>
      %72 = vector.shape_cast %71 : vector<1x256xf32> to vector<1x1x256xf32>
      %c0_41 = arith.constant 0 : index
      %c0_42 = arith.constant 0 : index
      %c0_43 = arith.constant 0 : index
      %73 = vector.load %arg10[%c0_41, %c0_42, %c0_43] : memref<1x1x256xf32, #tpu.memory_space<vmem>>, vector<1x1x256xf32>
      tpu.vector_store %arg10[%c0_41, %c0_42, %c0_43], %72 {strides = array<i32>} : memref<1x1x256xf32, #tpu.memory_space<vmem>>, vector<1x1x256xf32>,
      %c0_44 = arith.constant 0 : index
      %c0_45 = arith.constant 0 : index
      %74 = vector.load %arg13[%c0_44, %c0_45] : memref<1x1xf32, #tpu.memory_space<vmem>>, vector<1x1xf32>
      %75 = vector.shape_cast %74 : vector<1x1xf32> to vector<1x1xf32>
      %76 = vector.broadcast %75 : vector<1x1xf32> to vector<1x256xf32>
      %77 = vector.shape_cast %76 : vector<1x256xf32> to vector<1x1x256xf32>
      %c0_46 = arith.constant 0 : index
      %c0_47 = arith.constant 0 : index
      %c0_48 = arith.constant 0 : index
      %78 = vector.load %arg11[%c0_46, %c0_47, %c0_48] : memref<1x1x256xf32, #tpu.memory_space<vmem>>, vector<1x1x256xf32>
      tpu.vector_store %arg11[%c0_46, %c0_47, %c0_48], %77 {strides = array<i32>} : memref<1x1x256xf32, #tpu.memory_space<vmem>>, vector<1x1x256xf32>,
      %c0_49 = arith.constant 0 : index
      %c0_50 = arith.constant 0 : index
      %79 = vector.load %arg14[%c0_49, %c0_50] : memref<1x1xf32, #tpu.memory_space<vmem>>, vector<1x1xf32>
      %80 = vector.shape_cast %79 : vector<1x1xf32> to vector<1x1xf32>
      %81 = vector.broadcast %80 : vector<1x1xf32> to vector<1x256xf32>
      %82 = vector.shape_cast %81 : vector<1x256xf32> to vector<1x1x256xf32>
      %c0_51 = arith.constant 0 : index
      %c0_52 = arith.constant 0 : index
      %c0_53 = arith.constant 0 : index
      %83 = vector.load %arg12[%c0_51, %c0_52, %c0_53] : memref<1x1x256xf32, #tpu.memory_space<vmem>>, vector<1x1x256xf32>
      tpu.vector_store %arg12[%c0_51, %c0_52, %c0_53], %82 {strides = array<i32>} : memref<1x1x256xf32, #tpu.memory_space<vmem>>, vector<1x1x256xf32>,
    } else {
    }
    return
  }
  func.func @transform_0(%arg0: i32, %arg1: i32) -> (i32, i32) {
    %c1_i32 = arith.constant 1 : i32
    %0 = arith.muli %arg0, %c1_i32 : i32
    %1 = arith.addi %0, %arg1 : i32
    %c0_i32 = arith.constant 0 : i32
    %2 = arith.minsi %1, %c0_i32 : i32
    %c0_i32_0 = arith.constant 0 : i32
    %c0_i32_1 = arith.constant 0 : i32
    return %2, %c0_i32_0 : i32, i32
  }
  func.func @transform_1(%arg0: i32, %arg1: i32) -> (i32, i32) {
    %c0_i32 = arith.constant 0 : i32
    %c0_i32_0 = arith.constant 0 : i32
    %c0_i32_1 = arith.constant 0 : i32
    return %c0_i32, %c0_i32_0 : i32, i32
  }
  func.func @transform_2(%arg0: i32, %arg1: i32) -> (i32, i32) {
    %c0_i32 = arith.constant 0 : i32
    %c0_i32_0 = arith.constant 0 : i32
    %c0_i32_1 = arith.constant 0 : i32
    return %c0_i32, %c0_i32_0 : i32, i32
  }
  func.func @transform_3(%arg0: i32, %arg1: i32) -> (i32, i32) {
    %c0_i32 = arith.constant 0 : i32
    %c0_i32_0 = arith.constant 0 : i32
    %c0_i32_1 = arith.constant 0 : i32
    return %c0_i32, %c0_i32_0 : i32, i32
  }
  func.func @transform_4(%arg0: i32, %arg1: i32) -> (i32, i32) {
    %c0_i32 = arith.constant 0 : i32
    %c0_i32_0 = arith.constant 0 : i32
    %c0_i32_1 = arith.constant 0 : i32
    return %c0_i32, %c0_i32_0 : i32, i32
  }
  func.func @transform_5(%arg0: i32, %arg1: i32) -> (i32, i32) {
    %c0_i32 = arith.constant 0 : i32
    %c0_i32_0 = arith.constant 0 : i32
    %c0_i32_1 = arith.constant 0 : i32
    return %c0_i32, %c0_i32_0 : i32, i32
  }
  func.func @transform_6(%arg0: i32, %arg1: i32) -> (i32, i32) {
    %c0_i32 = arith.constant 0 : i32
    %c0_i32_0 = arith.constant 0 : i32
    %c0_i32_1 = arith.constant 0 : i32
    return %c0_i32, %c0_i32_0 : i32, i32
  }
  func.func @transform_7(%arg0: i32, %arg1: i32) -> (i32, i32) {
    %c1_i32 = arith.constant 1 : i32
    %0 = arith.muli %arg0, %c1_i32 : i32
    %1 = arith.addi %0, %arg1 : i32
    %c0_i32 = arith.constant 0 : i32
    %c0_i32_0 = arith.constant 0 : i32
    return %c0_i32, %1 : i32, i32
  }
  func.func @transform_8(%arg0: i32, %arg1: i32) -> (i32, i32, i32) {
    %c0_i32 = arith.constant 0 : i32
    %c0_i32_0 = arith.constant 0 : i32
    %c0_i32_1 = arith.constant 0 : i32
    return %arg0, %c0_i32, %c0_i32_0 : i32, i32, i32
  }
  func.func @transform_9(%arg0: i32, %arg1: i32) -> (i32, i32, i32) {
    %c0_i32 = arith.constant 0 : i32
    %c0_i32_0 = arith.constant 0 : i32
    %c0_i32_1 = arith.constant 0 : i32
    return %arg0, %c0_i32, %c0_i32_0 : i32, i32, i32
  }
  func.func @transform_10(%arg0: i32, %arg1: i32) -> (i32, i32, i32) {
    %c0_i32 = arith.constant 0 : i32
    %c0_i32_0 = arith.constant 0 : i32
    %c0_i32_1 = arith.constant 0 : i32
    return %arg0, %c0_i32, %c0_i32_0 : i32, i32, i32
  }
}

</mosaic_0001>

<bundles_post_ra>
// kernel: tpu_custom_call.1
= control target key start
LH: loop header
LB: loop body
LE: loop exit
PB: predicated region body
PF: predicated region fallthrough
CT: control target
= control target key end

     0   :  { %s1545_s0 = inlined_call_operand.vmem [shape: f32[8,512], index: 0, kind: input, shape index: {}]   ;;  %s1546_s1 = inlined_call_operand.hbm [shape: bf16[512,256], index: 1, kind: input, shape index: {}]   ;;  %s1547_s2 = inlined_call_operand.vmem [shape: f32[1,256], index: 2, kind: input, shape index: {}]   ;;  %s1548_s3 = inlined_call_operand.vmem [shape: bf16[256,64], index: 3, kind: input, shape index: {}]   ;;  %s1549_s4 = inlined_call_operand.vmem [shape: f32[1,64], index: 4, kind: input, shape index: {}]   ;;  %s1550_s5 = inlined_call_operand.vmem [shape: f32[1,64], index: 5, kind: input, shape index: {}]   ;;  %s1551_s6 = inlined_call_operand.<no memory space> [shape: f32[1,1], index: 6, kind: input, shape index: {}]   ;;  %s1552_s7 = inlined_call_operand.hbm [shape: f32[1,8], index: 7, kind: output, shape index: {0}]   ;;  %s1553_s8 = inlined_call_operand.hbm [shape: f32[1,1,256], index: 8, kind: output, shape index: {1}]   ;;  %s1554_s9 = inlined_call_operand.hbm [shape: f32[1,1,256], index: 9, kind: output, shape index: {2}]   ;;  %s1555_s10 = inlined_call_operand.hbm [shape: f32[1,1,256], index: 10, kind: output, shape index: {3}]  }
   0x1   :  { %v16_v0 = vstv %s1551_s6 }
   0x2   :  { %17 = vst [vmem:[#allocation5] sm:$0x1] %v16_v0 }
   0x3   :  { %18 = vsyncpa [#allocation7], 0 }
   0x4   :  { %19 = vsyncpa [#allocation8], 0 }
   0x5   :  { %20 = vsyncpa [#allocation11], 0 }
   0x6   :  { %21 = vsyncpa [#allocation14], 0  ;;  %s1350_s15 = smov [#allocation6]  }
   0x7   :  { %s40_s16 = sshll.u32 %s1350_s15, 4  ;;  %s41_s16 = int_to_ptr.vmem [resolvable:$true] %s40_s16 }
   0x8   :  { %s1250_s17 = scalar_lea.vmem %s41_s16, 8192  ;;  %p1255_p1 = scmp.lt.s32.totalorder %s41_s16, %s41_s16 }
   0x9   :  { %p1251_p0 = scmp.ne.s32.totalorder %s41_s16, %s1250_s17  ;;  %p1256_p2 = scmp.lt.s32.totalorder %s1250_s17, %s1250_s17 }
   0xb   :  { %p1257_p3 = por %p1256_p2, %p1255_p1 }
   0xd   :  { %p1258_p4 = pnand %p1257_p3, %p1251_p0 }
   0xf   :  { %1261 = shalt.err (!%p1258_p4)
}
  0x10   :  { %s1351_s18 = smov 128   ;;  %s1352_s19 = smov 8  }
  0x11   :  { %46 = dma.hbm_to_vmem [thread:$0]  %s1546_s1, 8192, %s41_s16, [#allocation7], %s1351_s18, %s1351_s18, %s1352_s19  }
  0x12   :  { %1342 = dma.done.wait [#allocation7], 8192  }
  0x13   :  { %1343 = vsyncadd [#allocation7], 4294959104  ;;  %v1124_v1 = vld [vmem:[#allocation6 + $0x74] ss:$8 sps:$4 sm:$0xff]   ;;  %v1128_v3 = vld [vmem:[#allocation6 + $0x70] ss:$8 sps:$4 sm:$0xff]  }
  0x14   :  { %v1126_v2 = vld [vmem:[#allocation6 + $0x174] ss:$8 sps:$4 sm:$0xff]   ;;  %504 = vmatprep.subr.bf16.mxu0 %v1124_v1  ;;  %v1129_v4 = vld [vmem:[#allocation6 + $0x170] ss:$8 sps:$4 sm:$0xff]   ;;  %v1130_v5 = vld [vmem:[#allocation6 + $0x64] ss:$8 sps:$4 sm:$0xff]  }
  0x15   :  { %545 = vmatprep.subr.bf16.mxu1 %v1126_v2  ;;  %505 = vmatpush1.bf16.msra.mxu0 %v1128_v3  ;;  %v1132_v6 = vld [vmem:[#allocation6 + $0x164] ss:$8 sps:$4 sm:$0xff]   ;;  %v1134_v7 = vld [vmem:[#allocation6 + $0x60] ss:$8 sps:$4 sm:$0xff]   ;;  %v1136_v9 = vld [vmem:[#allocation6 + $0x54] ss:$8 sps:$4 sm:$0xff]  }
  0x16   :  { %546 = vmatpush1.bf16.msra.mxu1 %v1129_v4  ;;  %506 = vmatprep.subr.bf16.mxu0 %v1130_v5  ;;  %v1135_v8 = vld [vmem:[#allocation6 + $0x160] ss:$8 sps:$4 sm:$0xff]   ;;  %v1138_v10 = vld [vmem:[#allocation6 + $0x154] ss:$8 sps:$4 sm:$0xff]   ;;  %v1140_v11 = vld [vmem:[#allocation6 + $0x50] ss:$8 sps:$4 sm:$0xff]  }
  0x17   :  { %547 = vmatprep.subr.bf16.mxu1 %v1132_v6  ;;  %v1141_v12 = vld [vmem:[#allocation6 + $0x150] ss:$8 sps:$4 sm:$0xff]   ;;  %v1142_v13 = vld [vmem:[#allocation6 + $0x44] ss:$8 sps:$4 sm:$0xff]   ;;  %v1146_v15 = vld [vmem:[#allocation6 + $0x40] ss:$8 sps:$4 sm:$0xff]  }
  0x18   :  { %v1144_v14 = vld [vmem:[#allocation6 + $0x144] ss:$8 sps:$4 sm:$0xff]   ;;  %v1147_v16 = vld [vmem:[#allocation6 + $0x140] ss:$8 sps:$4 sm:$0xff]   ;;  %v1148_v17 = vld [vmem:[#allocation6 + $0x34] ss:$8 sps:$4 sm:$0xff]  }
  0x19   :  { %507 = vmatpush1.bf16.msra.mxu0 %v1134_v7  ;;  %v1150_v18 = vld [vmem:[#allocation6 + $0x134] ss:$8 sps:$4 sm:$0xff]   ;;  %v1152_v19 = vld [vmem:[#allocation6 + $0x30] ss:$8 sps:$4 sm:$0xff]   ;;  %v1154_v21 = vld [vmem:[#allocation6 + $0x24] ss:$8 sps:$4 sm:$0xff]  }
  0x1a   :  { %548 = vmatpush1.bf16.msra.mxu1 %v1135_v8  ;;  %508 = vmatprep.subr.bf16.mxu0 %v1136_v9  ;;  %v1153_v20 = vld [vmem:[#allocation6 + $0x130] ss:$8 sps:$4 sm:$0xff]   ;;  %v1156_v22 = vld [vmem:[#allocation6 + $0x124] ss:$8 sps:$4 sm:$0xff]   ;;  %v1158_v23 = vld [vmem:[#allocation6 + $0x20] ss:$8 sps:$4 sm:$0xff]  }
  0x1b   :  { %549 = vmatprep.subr.bf16.mxu1 %v1138_v10  ;;  %v1159_v24 = vld [vmem:[#allocation6 + $0x120] ss:$8 sps:$4 sm:$0xff]   ;;  %v1160_v25 = vld [vmem:[#allocation6 + $0x14] ss:$8 sps:$4 sm:$0xff]   ;;  %v1164_v27 = vld [vmem:[#allocation6 + $0x10] ss:$8 sps:$4 sm:$0xff]  }
  0x1c   :  { %v1162_v26 = vld [vmem:[#allocation6 + $0x114] ss:$8 sps:$4 sm:$0xff]   ;;  %v1165_v28 = vld [vmem:[#allocation6 + $0x110] ss:$8 sps:$4 sm:$0xff]   ;;  %v1166_v29 = vld [vmem:[#allocation6 + $0x4] ss:$8 sps:$4 sm:$0xff]  }
  0x1d   :  { %509 = vmatpush1.bf16.msra.mxu0 %v1140_v11  ;;  %v1168_v30 = vld [vmem:[#allocation6 + $0x104] ss:$8 sps:$4 sm:$0xff]   ;;  %v1170_v31 = vld [vmem:[#allocation6] ss:$8 sps:$4 sm:$0xff]   ;;  %v1172_v33 = vld [vmem:[#allocation6 + $0xf4] ss:$8 sps:$4 sm:$0xff]  }
  0x1e   :  { %550 = vmatpush1.bf16.msra.mxu1 %v1141_v12  ;;  %510 = vmatprep.subr.bf16.mxu0 %v1142_v13  ;;  %v1171_v32 = vld [vmem:[#allocation6 + $0x100] ss:$8 sps:$4 sm:$0xff]   ;;  %v1174_v34 = vld [vmem:[#allocation6 + $0x1f4] ss:$8 sps:$4 sm:$0xff]   ;;  %v1176_v35 = vld [vmem:[#allocation6 + $0xf0] ss:$8 sps:$4 sm:$0xff]  }
  0x1f   :  { %551 = vmatprep.subr.bf16.mxu1 %v1144_v14  ;;  %v1177_v36 = vld [vmem:[#allocation6 + $0x1f0] ss:$8 sps:$4 sm:$0xff]   ;;  %v1178_v37 = vld [vmem:[#allocation6 + $0xe4] ss:$8 sps:$4 sm:$0xff]   ;;  %v1182_v39 = vld [vmem:[#allocation6 + $0xe0] ss:$8 sps:$4 sm:$0xff]  }
  0x20   :  { %v1180_v38 = vld [vmem:[#allocation6 + $0x1e4] ss:$8 sps:$4 sm:$0xff]   ;;  %v1183_v40 = vld [vmem:[#allocation6 + $0x1e0] ss:$8 sps:$4 sm:$0xff]   ;;  %v1184_v41 = vld [vmem:[#allocation6 + $0xd4] ss:$8 sps:$4 sm:$0xff]  }
  0x21   :  { %511 = vmatpush1.bf16.msra.mxu0 %v1146_v15  ;;  %v1186_v42 = vld [vmem:[#allocation6 + $0x1d4] ss:$8 sps:$4 sm:$0xff]   ;;  %v1188_v43 = vld [vmem:[#allocation6 + $0xd0] ss:$8 sps:$4 sm:$0xff]   ;;  %v1190_v45 = vld [vmem:[#allocation6 + $0xc4] ss:$8 sps:$4 sm:$0xff]  }
  0x22   :  { %552 = vmatpush1.bf16.msra.mxu1 %v1147_v16  ;;  %512 = vmatprep.subr.bf16.mxu0 %v1148_v17  ;;  %v1189_v44 = vld [vmem:[#allocation6 + $0x1d0] ss:$8 sps:$4 sm:$0xff]   ;;  %v1192_v46 = vld [vmem:[#allocation6 + $0x1c4] ss:$8 sps:$4 sm:$0xff]   ;;  %v1194_v48 = vld [vmem:[#allocation6 + $0xc0] ss:$8 sps:$4 sm:$0xff]  }
  0x23   :  { %553 = vmatprep.subr.bf16.mxu1 %v1150_v18  ;;  %v101_v47 = vld [vmem:[%s1545_s0 + $0x8] sm:$0xff]  ;;  %v103_v51 = vld [vmem:[%s1545_s0 + $0x18] sm:$0xff]  ;;  %v100_v5 = vld [vmem:[%s1545_s0] sm:$0xff]  ;;  %vm86_vm0 = vcmask 0   ;;  %vm778_vm1 = vcmask 523264   ;;  %vm826_vm3 = vcmask 7168  }
  0x24   :  { %v1195_v49 = vld [vmem:[#allocation6 + $0x1c0] ss:$8 sps:$4 sm:$0xff]   ;;  %v105_v50 = vpack.c.bf16 %v101_v47, %v101_v47  ;;  %v1196_v52 = vld [vmem:[#allocation6 + $0xb4] ss:$8 sps:$4 sm:$0xff]   ;;  %v107_v53 = vpack.c.bf16 %v103_v51, %v103_v51  ;;  %v1200_v55 = vld [vmem:[#allocation6 + $0xb0] ss:$8 sps:$4 sm:$0xff]   ;;  %v104_v8 = vpack.c.bf16 %v100_v5, %v100_v5 }
  0x25   :  { %513 = vmatpush1.bf16.msra.mxu0 %v1152_v19  ;;  %v1198_v54 = vld [vmem:[#allocation6 + $0x1b4] ss:$8 sps:$4 sm:$0xff]   ;;  %v1201_v56 = vld [vmem:[#allocation6 + $0x1b0] ss:$8 sps:$4 sm:$0xff]   ;;  %v1202_v57 = vld [vmem:[#allocation6 + $0xa4] ss:$8 sps:$4 sm:$0xff]  }
  0x26   :  { %554 = vmatpush1.bf16.msra.mxu1 %v1153_v20  ;;  %514 = vmatprep.subr.bf16.mxu0 %v1154_v21  ;;  %v1204_v58 = vld [vmem:[#allocation6 + $0x1a4] ss:$8 sps:$4 sm:$0xff]   ;;  %v1206_v59 = vld [vmem:[#allocation6 + $0xa0] ss:$8 sps:$4 sm:$0xff]   ;;  %v1208_v61 = vld [vmem:[#allocation6 + $0x94] ss:$8 sps:$4 sm:$0xff]  }
  0x27   :  { %555 = vmatprep.subr.bf16.mxu1 %v1156_v22  ;;  %536 = vmatprep.mubr.bf16.mxu0 %v105_v50  ;;  %v1207_v60 = vld [vmem:[#allocation6 + $0x1a0] ss:$8 sps:$4 sm:$0xff]   ;;  %v1210_v62 = vld [vmem:[#allocation6 + $0x194] ss:$8 sps:$4 sm:$0xff]   ;;  %v1212_v63 = vld [vmem:[#allocation6 + $0x90] ss:$8 sps:$4 sm:$0xff]  }
  0x28   :  { %577 = vmatprep.mubr.bf16.mxu1 %v107_v53  ;;  %v1213_v0 = vld [vmem:[#allocation6 + $0x190] ss:$8 sps:$4 sm:$0xff]   ;;  %v1214_v1 = vld [vmem:[#allocation6 + $0x84] ss:$8 sps:$4 sm:$0xff]   ;;  %v1218_v3 = vld [vmem:[#allocation6 + $0x80] ss:$8 sps:$4 sm:$0xff]  }
  0x29   :  { %515 = vmatpush1.bf16.msra.mxu0 %v1158_v23  ;;  %v1216_v2 = vld [vmem:[#allocation6 + $0x184] ss:$8 sps:$4 sm:$0xff]   ;;  %v1219_v4 = vld [vmem:[#allocation6 + $0x180] ss:$8 sps:$4 sm:$0xff]   ;;  %v1220_v7 = vld [vmem:[%s1548_s3 + $0x78] sm:$0xff]   ;;  %s1358_s20 = smov [#allocation10]  }
  0x2a   :  { %556 = vmatpush1.bf16.msra.mxu1 %v1159_v24  ;;  %516 = vmatprep.subr.bf16.mxu0 %v1160_v25  ;;  %v102_v6 = vld [vmem:[%s1545_s0 + $0x10] sm:$0xff]  ;;  %v1221_v10 = vld [vmem:[%s1548_s3 + $0x38] sm:$0xff]   ;;  %v1224_v13 = vld [vmem:[%s1548_s3 + $0x68] sm:$0xff]   ;;  %v89_v25 = vlaneseq  ;;  %s960_s21 = sshll.u32 %s1358_s20, 4  ;;  %s1359_s1 = smov [#allocation12]   ;;  %s961_s21 = int_to_ptr.vmem [resolvable:$true] %s960_s21 }
  0x2b   :  { %557 = vmatprep.subr.bf16.mxu1 %v1162_v26  ;;  %v106_v9 = vpack.c.bf16 %v102_v6, %v102_v6  ;;  %v1222_v11 = vld [vmem:[%s1548_s3 + $0x70] sm:$0xff]   ;;  %v1225_v14 = vld [vmem:[%s1548_s3 + $0x28] sm:$0xff]   ;;  %v1226_v15 = vld [vmem:[%s1548_s3 + $0x60] sm:$0xff]   ;;  %s970_s6 = sshll.u32 %s1359_s1, 4  ;;  %s971_s6 = int_to_ptr.vmem [resolvable:$true] %s970_s6 }
  0x2c   :  { %v1223_v12 = vld [vmem:[%s1548_s3 + $0x30] sm:$0xff]   ;;  %v1227_v16 = vld [vmem:[%s1548_s3 + $0x20] sm:$0xff]   ;;  %v1228_v17 = vld [vmem:[%s1548_s3 + $0x58] sm:$0xff]   ;;  %v1482_v26 = vshrl.u32 %v89_v25, 7  ;;  %vm1508_vm2 = vcmp.lt.s32.totalorder %v89_v25, 256 }
  0x2d   :  { %517 = vmatpush1.bf16.msra.mxu0 %v1164_v27  ;;  %v1229_v18 = vld [vmem:[%s1548_s3 + $0x18] sm:$0xff]   ;;  %v1230_v19 = vld [vmem:[%s1548_s3 + $0x50] sm:$0xff]   ;;  %v1232_v21 = vld [vmem:[%s1548_s3 + $0x48] sm:$0xff]  }
  0x2e   :  { %558 = vmatpush1.bf16.msra.mxu1 %v1165_v28  ;;  %518 = vmatprep.subr.bf16.mxu0 %v1166_v29  ;;  %v1231_v20 = vld [vmem:[%s1548_s3 + $0x10] sm:$0xff]   ;;  %v1233_v22 = vld [vmem:[%s1548_s3 + $0x8] sm:$0xff]   ;;  %v1234_v23 = vld [vmem:[%s1548_s3 + $0x40] sm:$0xff]   ;;  %v1485_v27 = vsub.s32 0, %v1482_v26  ;;  %v180_v29 = vsub.s32 1, %v1482_v26 }
  0x2f   :  { %559 = vmatprep.subr.bf16.mxu1 %v1168_v30  ;;  %v1235_v24 = vld [vmem:[%s1548_s3] sm:$0xff]  }
  0x30   :  { %v172_v28 = vld [vmem:[%s1547_s2] sm:$0x3] }
  0x31   :  { %519 = vmatpush1.bf16.msra.mxu0 %v1170_v31  ;;  %v177_v30 = vrot.slane %v172_v28, %v1485_v27  ;;  %v181_v31 = vrot.slane %v172_v28, %v180_v29  ;;  %v1070_v51 = vld [vmem:[%s1549_s4] ss:$0 sm:$0xff]  ;;  %s1357_s4 = smov [#allocation13]  }
  0x32   :  { %560 = vmatpush1.bf16.msra.mxu1 %v1171_v32  ;;  %520 = vmatprep.subr.bf16.mxu0 %v1172_v33 }
  0x33   :  { %561 = vmatprep.subr.bf16.mxu1 %v1174_v34 }
  0x35   :  { %521 = vmatpush2.bf16.msra.mxu0 %v1176_v35 }
  0x36   :  { %562 = vmatpush2.bf16.msra.mxu1 %v1177_v36  ;;  %522 = vmatprep.subr.bf16.mxu0 %v1178_v37 }
  0x37   :  { %563 = vmatprep.subr.bf16.mxu1 %v1180_v38 }
  0x39   :  { %523 = vmatpush2.bf16.msra.mxu0 %v1182_v39 }
  0x3a   :  { %564 = vmatpush2.bf16.msra.mxu1 %v1183_v40  ;;  %524 = vmatprep.subr.bf16.mxu0 %v1184_v41 }
  0x3b   :  { %565 = vmatprep.subr.bf16.mxu1 %v1186_v42 }
  0x3d   :  { %525 = vmatpush2.bf16.msra.mxu0 %v1188_v43 }
  0x3e   :  { %566 = vmatpush2.bf16.msra.mxu1 %v1189_v44  ;;  %526 = vmatprep.subr.bf16.mxu0 %v1190_v45 }
  0x3f   :  { %567 = vmatprep.subr.bf16.mxu1 %v1192_v46 }
  0x41   :  { %527 = vmatpush2.bf16.msra.mxu0 %v1194_v48  ;;  %v1353_v48 = vmov -inf  }
  0x42   :  { %568 = vmatpush2.bf16.msra.mxu1 %v1195_v49  ;;  %528 = vmatprep.subr.bf16.mxu0 %v1196_v52  ;;  %87 = vst.msk [vmem:[#allocation2] sm:$0x1] %vm86_vm0, %v1353_v48  ;;  %v1354_v49 = vmov 0.0  }
  0x43   :  { %569 = vmatprep.subr.bf16.mxu1 %v1198_v54  ;;  %88 = vst.msk [vmem:[#allocation3] sm:$0x1] %vm86_vm0, %v1354_v49 }
  0x44   :  { %93 = vst.msk [vmem:[#allocation4] sm:$0x3] %vm1508_vm2, %v1354_v49 }
  0x45   :  { %529 = vmatpush2.bf16.msra.mxu0 %v1200_v55 }
  0x46   :  { %570 = vmatpush2.bf16.msra.mxu1 %v1201_v56  ;;  %530 = vmatprep.subr.bf16.mxu0 %v1202_v57  ;;  %v1087_v57 = vld [vmem:[%s1550_s5] ss:$0 sm:$0xff]  ;;  %s980_s5 = sshll.u32 %s1357_s4, 4  ;;  %s981_s5 = int_to_ptr.vmem [resolvable:$true] %s980_s5 }
  0x47   :  { %571 = vmatprep.subr.bf16.mxu1 %v1204_v58  ;;  %s1262_s22 = scalar_lea.vmem %s981_s5, 32  ;;  %p1267_p6 = scmp.lt.s32.totalorder %s981_s5, %s981_s5 }
  0x48   :  { %p1263_p5 = scmp.ne.s32.totalorder %s981_s5, %s1262_s22  ;;  %p1268_p7 = scmp.lt.s32.totalorder %s1262_s22, %s1262_s22 }
  0x49   :  { %531 = vmatpush2.bf16.msra.mxu0 %v1206_v59 }
  0x4a   :  { %572 = vmatpush2.bf16.msra.mxu1 %v1207_v60  ;;  %532 = vmatprep.subr.bf16.mxu0 %v1208_v61  ;;  %v1355_v61 = vmov 0   ;;  %p1269_p8 = por %p1268_p7, %p1267_p6 }
  0x4b   :  { %573 = vmatprep.subr.bf16.mxu1 %v1210_v62  ;;  %1123 = vset.pattern.permute.xlu1 %v1355_v61 }
  0x4c   :  { %1122 = vset.pattern.permute.xlu0 %v1355_v61  ;;  %p1270_p9 = pnand %p1269_p8, %p1263_p5 }
  0x4d   :  { %533 = vmatpush2.bf16.msra.mxu0 %v1212_v63  ;;  %v1088_v63 = vld [vmem:[#allocation5] ss:$0 sm:$0xff] }
  0x4e   :  { %574 = vmatpush2.bf16.msra.mxu1 %v1213_v0  ;;  %534 = vmatprep.subr.bf16.mxu0 %v1214_v1 }
  0x4f   :  { %575 = vmatprep.subr.bf16.mxu1 %v1216_v2 }
  0x51   :  { %535 = vmatpush2.bf16.msra.mxu0 %v1218_v3 }
  0x52   :  { %576 = vmatpush2.bf16.msra.mxu1 %v1219_v4  ;;  %1089 = vmatprep.subr.bf16.mxu0 %v1220_v7 }
  0x54   :  { %537 = vmatmul.mubr.bf16.vlgmr.msra.gmra.mxu0 %v104_v8  ;;  %v825_v8 = vld [vmem:[#allocation2] sm:$0x1] }
  0x55   :  { %578 = vmatmul.mubr.bf16.vlgmr.msra.gmra.mxu1 %v106_v9  ;;  %1090 = vmatpush3.bf16.msra.mxu0 %v1221_v10 }
  0x56   :  { %1091 = vmatprep.subr.bf16.mxu0 %v1222_v11 }
  0x59   :  { %1092 = vmatpush3.bf16.msra.mxu0 %v1223_v12 }
  0x5a   :  { %1093 = vmatprep.subr.bf16.mxu0 %v1224_v13 }
  0x5d   :  { %1094 = vmatpush3.bf16.msra.mxu0 %v1225_v14 }
  0x5e   :  { %1095 = vmatprep.subr.bf16.mxu0 %v1226_v15 }
  0x61   :  { %1096 = vmatpush3.bf16.msra.mxu0 %v1227_v16 }
  0x62   :  { %1097 = vmatprep.subr.bf16.mxu0 %v1228_v17 }
  0x65   :  { %1098 = vmatpush3.bf16.msra.mxu0 %v1229_v18 }
  0x66   :  { %1099 = vmatprep.subr.bf16.mxu0 %v1230_v19 }
  0x69   :  { %1100 = vmatpush3.bf16.msra.mxu0 %v1231_v20 }
  0x6a   :  { %1101 = vmatprep.subr.bf16.mxu0 %v1232_v21 }
  0x6d   :  { %1102 = vmatpush3.bf16.msra.mxu0 %v1233_v22 }
  0x6e   :  { %1103 = vmatprep.subr.bf16.mxu0 %v1234_v23 }
  0x71   :  { %1104 = vmatpush3.bf16.msra.mxu0 %v1235_v24  ;;  %v847_v24 = vld [vmem:[#allocation3] sm:$0x1] }
 0x114   :  { %v538_v32 = vpop.f32.mrf.mxu0 }
 0x115   :  { %v579_v33 = vpop.f32.mrf.mxu1  ;;  %v539_v34 = vadd.f32 %v538_v32, %v177_v30 }
 0x116   :  { %v540_v35 = vpop.f32.mrf.mxu0 }
 0x117   :  { %v581_v36 = vpop.f32.mrf.mxu1  ;;  %v580_v37 = vadd.f32 %v579_v33, %v539_v34  ;;  %v541_v38 = vadd.f32 %v540_v35, %v181_v31 }
 0x118   :  { %v542_v39 = vpop.f32.mrf.mxu0 }
 0x119   :  { %v583_v40 = vpop.f32.mrf.mxu1  ;;  %v582_v41 = vadd.f32 %v581_v36, %v541_v38  ;;  %v1492_v42 = vmax.f32 %v580_v37, 0.0 }
 0x11a   :  { %v543_v43 = vpop.f32.mrf.mxu0  ;;  %v1356_v40 = vmov 1966171168  }
 0x11b   :  { %v584_v44 = vpop.f32.mrf.mxu1  ;;  %v1494_v45 = vmax.f32 %v582_v41, 0.0  ;;  %v592_v47 = vpack.c.bf16 %v1492_v42, %v1492_v42  ;;  %v893_v41 = vunpack.c.l.s4 %v1356_v40 }
 0x11d   :  { %v593_v46 = vpack.c.bf16 %v1494_v45, %v1494_v45  ;;  %v894_v48 = vunpack.c.0.s8 %v893_v41 }
 0x11f   :  { %761 = vmatprep.mubr.bf16.mxu0 %v593_v46 }
 0x120   :  { %762 = vmatmul.mubr.bf16.vlgmr.msra.gmra.mxu0 %v592_v47 }
 0x1e0   :  { %v1105_v50 = vpop.f32.mrf.mxu0 }
 0x1e2   :  { %v1106_v52 = vpop.f32.mrf.mxu0 }
 0x1e3   :  { %v1107_v53 = vadd.f32 %v1106_v52, %v1105_v50 }
 0x1e4   :  { %v1108_v54 = vpop.f32.mrf.mxu0 }
 0x1e5   :  { %v764_v55 = vadd.f32 %v1107_v53, %v1070_v51 }
 0x1e6   :  { %v1109_v56 = vpop.f32.mrf.mxu0 }
 0x1e7   :  { %1236 = vtanh.f32 %v764_v55  ;;  %v859_v56 = vld [vmem:[#allocation4] sm:$0x3] }
 0x1f4   :  { %v1237_v58 = vpop.eup %1236 }
 0x1f5   :  { %v777_v59 = vmul.f32 %v1237_v58, %v1087_v57 }
 0x1f7   :  { %v779_v60 = vsel %vm778_vm1, %v777_v59, 0.0 }
 0x1f8   :  { %780 = vadd.xlane.f32.xlu0 %v779_v60 }
 0x281   :  { %v781_v0 = vpop.xlane.xlu0 %780 }
 0x282   :  { %v789_v1 = vadd.f32 %v1088_v63, %v781_v0 }
 0x284   :  { %v827_v2 = vsel %vm826_vm3, %v789_v1, -inf }
 0x285   :  { %v828_v3 = vrot.slane %v827_v2, 4 }
 0x287   :  { %v829_v4 = vmax.f32 %v827_v2, %v828_v3 }
 0x289   :  { %v830_v5 = vrot.slane %v829_v4, 2 }
 0x28b   :  { %v831_v6 = vmax.f32 %v829_v4, %v830_v5 }
 0x28d   :  { %v832_v7 = vrot.slane %v831_v6, 1 }
 0x28f   :  { %v833_v9 = vmax.f32 %v831_v6, %v832_v7 }
 0x291   :  { %v834_v10 = vmax.f32 %v825_v8, %v833_v9 }
 0x293   :  { %v842_v11 = vrot.slane %v834_v10, %v1485_v27  ;;  %913 = vst.msk [vmem:[#allocation2] sm:$0x1] %vm86_vm0, %v834_v10  ;;  %v835_v12 = vsub.f32 %v825_v8, %v834_v10 }
 0x295   :  { %v844_v13 = vsub.f32 %v789_v1, %v842_v11  ;;  %v836_v14 = vmul.f32 1.442695, %v835_v12 }
 0x297   :  { %v845_v15 = vmul.f32 1.442695, %v844_v13  ;;  %1238 = vpow2.f32 %v836_v14 }
 0x299   :  { %1240 = vpow2.f32 %v845_v15 }
 0x29a   :  { %v919_v20 = vld [vmem:[#allocation2] sm:$0x1] }
 0x2a4   :  { %v1239_v16 = vpop.eup %1238 }
 0x2a5   :  { %862 = vperm.xlu1 %1123, %v1239_v16   ;;  %v848_v29 = vmul.f32 %v1239_v16, %v847_v24 }
 0x2a6   :  { %v1241_v17 = vpop.eup %1240 }
 0x2a7   :  { %v849_v18 = vsel %vm826_vm3, %v1241_v17, 0.0  ;;  %872 = vperm.xlu0 %1122, %v1241_v17  }
 0x2a8   :  { %v850_v19 = vrot.slane %v849_v18, 4 }
 0x2a9   :  { %922 = vperm.xlu1 %1123, %v919_v20  }
 0x2aa   :  { %v851_v21 = vadd.f32 %v850_v19, %v849_v18 }
 0x2ac   :  { %v852_v22 = vrot.slane %v851_v21, 2 }
 0x2ae   :  { %v853_v23 = vadd.f32 %v852_v22, %v851_v21 }
 0x2b0   :  { %v854_v25 = vrot.slane %v853_v23, 1 }
 0x2b2   :  { %v855_v28 = vadd.f32 %v854_v25, %v853_v23 }
 0x2b4   :  { %v856_v30 = vadd.f32 %v855_v28, %v848_v29 }
 0x2b6   :  { %858 = vst.msk [vmem:[#allocation3] sm:$0x1] %vm86_vm0, %v856_v30 }
 0x2bd   :  { %v930_v31 = vld [vmem:[#allocation3] sm:$0x1] }
 0x2be   :  { %933 = vperm.xlu1 %1123, %v930_v31  }
 0x2e7   :  { %791 = vxpose.xlu1.b32.start.end [1/1] (short) (narrow) %v789_v1, 8 }
 0x320   :  { %v863_v32 = vpop.permute.xlu1 %862 }
 0x321   :  { %v868_v54 = vrot.slane %v863_v32, %v1485_v27 }
 0x322   :  { %v873_v33 = vpop.permute.xlu0 %872 }
 0x323   :  { %v875_v34 = vmul.f32 %v873_v33, %v1492_v42  ;;  %v876_v35 = vmul.f32 %v873_v33, %v1494_v45  ;;  %v897_v45 = vsub.s32 %v894_v48, %v1482_v26  ;;  %v869_v58 = vmul.f32 %v868_v54, %v859_v56 }
 0x324   :  { %v923_v36 = vpop.permute.xlu1 %922 }
 0x325   :  { %v877_v37 = vrot.slane %v875_v34, 4  ;;  %v883_v38 = vrot.slane %v876_v35, 4  ;;  %v928_v39 = vrot.slane %v923_v36, %v1485_v27 }
 0x327   :  { %v878_v43 = vadd.f32 %v877_v37, %v875_v34  ;;  %v884_v44 = vadd.f32 %v883_v38, %v876_v35  ;;  %929 = vst.msk [vmem:[#allocation12] sm:$0x3] %vm1508_vm2, %v928_v39 }
 0x329   :  { %v879_v46 = vrot.slane %v878_v43, 2  ;;  %v885_v47 = vrot.slane %v884_v44, 2 }
 0x32b   :  { %v880_v49 = vadd.f32 %v879_v46, %v878_v43  ;;  %v886_v50 = vadd.f32 %v885_v47, %v884_v44 }
 0x32d   :  { %v881_v42 = vrot.slane %v880_v49, 1  ;;  %v887_v51 = vrot.slane %v886_v50, 1 }
 0x32f   :  { %v882_v52 = vadd.f32 %v881_v42, %v880_v49  ;;  %v888_v53 = vadd.f32 %v887_v51, %v886_v50 }
 0x331   :  { %v891_v55 = vcombine.low %v882_v52, %v888_v53 }
 0x333   :  { %v898_v57 = vrot.slane %v891_v55, %v897_v45 }
 0x335   :  { %v905_v59 = vrot.slane %v898_v57, %v897_v45 }
 0x337   :  { %v907_v60 = vadd.f32 %v905_v59, %v869_v58 }
 0x339   :  { %912 = vst.msk [vmem:[#allocation4] sm:$0x3] %vm1508_vm2, %v907_v60  ;;  %v934_v61 = vpop.permute.xlu1 %933 }
 0x33a   :  { %v939_v63 = vrot.slane %v934_v61, %v1485_v27 }
 0x33c   :  { %940 = vst.msk [vmem:[#allocation13] sm:$0x3] %vm1508_vm2, %v939_v63 }
 0x33d   :  { %1273 = shalt.err (!%p1270_p9)
}
 0x33e   :  { %983 = dma.vmem_to_hbm [thread:$0]  %s981_s5, 32, %s1555_s10, [#allocation14]  }
 0x33f   :  { %s1282_s25 = scalar_lea.vmem %s961_s21, 32  ;;  %p1287_p11 = scmp.lt.s32.totalorder %s961_s21, %s961_s21 }
 0x340   :  { %v917_v26 = vld [vmem:[#allocation4] sm:$0x3]  ;;  %p1283_p10 = scmp.ne.s32.totalorder %s961_s21, %s1282_s25  ;;  %p1288_p12 = scmp.lt.s32.totalorder %s1282_s25, %s1282_s25 }
 0x341   :  { %918 = vst.msk [vmem:[#allocation10] sm:$0x3] %vm1508_vm2, %v917_v26 }
 0x342   :  { %p1289_p13 = por %p1288_p12, %p1287_p11 }
 0x344   :  { %p1290_p0 = pnand %p1289_p13, %p1283_p10 }
 0x346   :  { %1293 = shalt.err (!%p1290_p0)
}
 0x347   :  { %963 = dma.vmem_to_hbm [thread:$0]  %s961_s21, 32, %s1553_s8, [#allocation11]  }
 0x348   :  { %s1302_s28 = scalar_lea.vmem %s971_s6, 32  ;;  %p1307_p2 = scmp.lt.s32.totalorder %s971_s6, %s971_s6 }
 0x349   :  { %p1303_p1 = scmp.ne.s32.totalorder %s971_s6, %s1302_s28  ;;  %p1308_p3 = scmp.lt.s32.totalorder %s1302_s28, %s1302_s28 }
 0x34b   :  { %p1309_p4 = por %p1308_p3, %p1307_p2 }
 0x34d   :  { %p1310_p5 = pnand %p1309_p4, %p1303_p1 }
 0x34f   :  { %1313 = shalt.err (!%p1310_p5)
}
 0x350   :  { %973 = dma.vmem_to_hbm [thread:$0]  %s971_s6, 32, %s1554_s9, [#allocation11]   ;;  %vm823_vm4 = vcmask 57344  }
 0x351   :  { %s1360_s30 = smov [#allocation9]  }
 0x352   :  { %s950_s11 = sshll.u32 %s1360_s30, 4  ;;  %s951_s11 = int_to_ptr.vmem [resolvable:$true] %s950_s11 }
 0x353   :  { %s1322_s12 = scalar_lea.vmem %s951_s11, 16  ;;  %s1326_s8 = scalar_lea.vmem %s951_s11, 32 }
 0x354   :  { %p1323_p6 = scmp.ne.s32.totalorder %s951_s11, %s1322_s12  ;;  %p1327_p7 = scmp.lt.s32.totalorder %s951_s11, %s951_s11 }
 0x355   :  { %p1328_p8 = scmp.lt.s32.totalorder %s1326_s8, %s1322_s12 }
 0x357   :  { %p1329_p9 = por %p1328_p8, %p1327_p7 }
 0x359   :  { %p1330_p10 = pnand %p1329_p9, %p1323_p6 }
 0x363   :  { %v807_v27 = vpop.trf.xlu1 }
 0x364   :  { %824 = vst.msk [vmem:[#allocation9] sm:$0x1] %vm823_vm4, %v807_v27 }
 0x365   :  { %1333 = shalt.err (!%p1330_p10)
}
 0x366   :  { %953 = dma.vmem_to_hbm [thread:$0]  %s951_s11, 16, %s1552_s7, [#allocation8]  }
 0x367   :  { %1344 = dma.done.wait [#allocation8], 16  }
 0x368   :  { %1345 = vsyncadd [#allocation8], 4294967280 }
 0x369   :  { %1346 = dma.done.wait [#allocation11], 64  }
 0x36a   :  { %1347 = vsyncadd [#allocation11], 4294967232 }
 0x36b   :  { %1348 = dma.done.wait [#allocation14], 32  }
 0x36c   :  { %1349 = vsyncadd [#allocation14], 4294967264 }
 0x36d   :  { %996 = vsyncpa [#allocation7], 1 }
 0x36e   :  { %997 = vsyncpa [#allocation8], 1 }
 0x36f   :  { %998 = vsyncpa [#allocation11], 1 }
 0x370   :  { %999 = vsyncpa [#allocation14], 1 }

</bundles_post_ra>
